<compile_context>
chip_gen: v6e
topology: v6e:2x2x1
jax: 0.10.0
libtpu: 0.0.40
codegen_flags: <defaults>
</compile_context>

<pallas_src>
import jax
import jax.numpy as jnp
from jax import lax
from jax.experimental import pallas as pl
from jax.experimental.pallas import tpu as pltpu

_MIB = 1024 * 1024


def _sublane_granularity(dtype):
    # Second-to-last block dim granularity: 8 for 4-byte, 16 for 2-byte,
    # 32 for 1-byte dtypes.
    return {4: 8, 2: 16, 1: 32}.get(jnp.dtype(dtype).itemsize, 8)


def _vmem_capacity_bytes():
    try:
        return int(pltpu.get_tpu_info().vmem_capacity_bytes)
    except Exception:
        return 64 * _MIB  # conservative default (v7x per-TensorCore)


def _footprint_bytes(tile_m, tile_n, N, D, itemsize):
    a_io = 2 * tile_m * D * itemsize          # A tile, double-buffered
    o_io = 2 * tile_m * D * itemsize          # out tile, double-buffered
    b_io = 1 * N * D * itemsize               # B block, single-buffered
    scratch = (tile_m * tile_n + 2 * tile_m * D) * 4   # fp32 S, R, A-cast
    return a_io + o_io + b_io + scratch


def _make_kernel(tile_n, n_chunks):
    def kernel(a_ref, b_ref, o_ref):
        a = a_ref[...]                         # (tile_m, D)
        a_f32 = a.astype(jnp.float32)

        def chunk(b_chunk, acc):
            # S = A @ B_c^T : contract the shared feature dim; the MXU handles
            # the transpose implicitly (no XLU transpose).
            s = lax.dot_general(
                a, b_chunk, (((1,), (1,)), ((), ())),
                preferred_element_type=jnp.float32)            # (tile_m, tile_n)
            # R += S @ B_c : cast S back to the operand dtype (identity for
            # fp32 inputs; keeps the MXU at native bf16 rate for bf16 inputs).
            return acc + lax.dot_general(
                s.astype(b_chunk.dtype), b_chunk, (((1,), (0,)), ((), ())),
                preferred_element_type=jnp.float32)            # (tile_m, D)

        if n_chunks == 1:
            r = chunk(b_ref[...], jnp.zeros_like(a_f32))
        else:
            def body(c, acc):
                start = pl.multiple_of(c * tile_n, tile_n)
                return chunk(b_ref[pl.ds(start, tile_n), :], acc)
            r = lax.fori_loop(0, n_chunks, body, jnp.zeros_like(a_f32))

        o_ref[...] = (r + a_f32).astype(o_ref.dtype)

    return kernel


def pro_fusion_forward(A, B, *, max_tile_m=None, max_tile_n=512):
    """A: (bs, M, D); B: (bs, N, D) -> (bs, M, D) = A @ B^T @ B + A."""
    bs, M, D = A.shape
    bs2, N, D2 = B.shape
    assert bs == bs2 and D == D2, "shape mismatch between A and B"

    itemsize = jnp.dtype(A.dtype).itemsize
    gran = _sublane_granularity(A.dtype)

    vmem_cap = _vmem_capacity_bytes()
    # Leave headroom for compiler-internal scratch / semaphores.
    vmem_budget = max(vmem_cap - 16 * _MIB, vmem_cap // 2)

    if max_tile_m is None:
        # v5e/v6e (128 MiB VMEM) can afford 512-row tiles; v7x (64 MiB/TC)
        # defaults to 256, which also matches its 2x256x256 MXU granularity.
        max_tile_m = 512 if vmem_cap >= 96 * _MIB else 256

    # ---- N chunking: bound the fp32 (tile_m, N) intermediate --------------
    if N <= max(max_tile_n, gran):
        tile_n, n_chunks = N, 1
    else:
        tile_n = 0
        for cand in range(max_tile_n, gran - 1, -gran):
            if N % cand == 0:
                tile_n = cand
                break
        if tile_n == 0:
            # TODO(synk): pad B's N dimension (zero rows are exact) for ragged N.
            tile_n, n_chunks = N, 1
        else:
            n_chunks = N // tile_n

    # ---- tile_m: MXU/sublane-friendly divisor of M that fits VMEM ---------
    cands = [t for t in range(gran, min(M, max_tile_m) + 1, gran) if M % t == 0]
    if M <= max_tile_m:
        cands.append(M)          # full-M block is always layout-legal
    cands = sorted(set(cands), reverse=True) or [M]
    tile_m = cands[-1]
    for t in cands:
        if _footprint_bytes(t, tile_n, N, D, itemsize) <= vmem_budget:
            tile_m = t
            break

    grid = (bs, M // tile_m)
    footprint = _footprint_bytes(tile_m, tile_n, N, D, itemsize)
    vmem_limit = int(min(vmem_cap, max(footprint + 4 * _MIB, 32 * _MIB)))

    flops = 4 * bs * M * N * D                          # two matmuls per batch
    bytes_accessed = (2 * A.size + B.size) * itemsize   # A read + out write + B read

    return pl.pallas_call(
        _make_kernel(tile_n, n_chunks),
        out_shape=jax.ShapeDtypeStruct((bs, M, D), A.dtype),
        grid_spec=pltpu.PrefetchScalarGridSpec(
            num_scalar_prefetch=0,
            grid=grid,
            in_specs=[
                # A tile: changes with both grid axes, default double-buffering.
                pl.BlockSpec((pl.Squeezed(), tile_m, D), lambda b, i: (b, i, 0)),
                # B: constant over the inner M-tile axis -> VMEM-resident across
                # all M tiles of a batch; single-buffered to save N*D*itemsize.
                pl.BlockSpec((pl.Squeezed(), N, D), lambda b, i: (b, 0, 0),
                             pipeline_mode=pl.Buffered(1)),
            ],
            out_specs=pl.BlockSpec((pl.Squeezed(), tile_m, D),
                                   lambda b, i: (b, i, 0)),
        ),
        compiler_params=pltpu.CompilerParams(
            # Both axes are independent -> shardable across v7x's 2 TensorCores.
            dimension_semantics=("parallel", "parallel"),
            vmem_limit_bytes=vmem_limit,
        ),
        cost_estimate=pl.CostEstimate(
            flops=flops, transcendentals=0, bytes_accessed=bytes_accessed),
    )(A, B)


def reference_forward(A, B):
    return jnp.matmul(jnp.matmul(A, jnp.swapaxes(B, 1, 2)), B) + A


if __name__ == "__main__":
    # Small shapes consistent with proFusion's batched-matmul forward:
    # A: (batch, M, D), B: (batch, N, D).
    bs, M, N, D = 2, 16, 8, 32

    key = jax.random.PRNGKey(0)
    ka, kb = jax.random.split(key)
    A = jax.random.normal(ka, (bs, M, D), jnp.float32)
    B = jax.random.normal(kb, (bs, N, D), jnp.float32)

    out = pro_fusion_forward(A, B)
    out = jax.block_until_ready(out)

    ref = reference_forward(A, B)
    assert out.shape == (bs, M, D)
    assert jnp.allclose(out, ref, atol=1e-3, rtol=1e-3), "mismatch vs reference"

    print("KERNEL_OK")
</pallas_src>

<mosaic_0001>
module attributes {stable_mosaic.version = 11 : i64} {
  func.func @kernel(%arg0: i32, %arg1: i32, %arg2: memref<1x16x32xf32, #tpu.memory_space<vmem>>, %arg3: memref<1x8x32xf32, #tpu.memory_space<vmem>>, %arg4: memref<1x16x32xf32, #tpu.memory_space<vmem>>) attributes {dimension_semantics = [#tpu.dimension_semantics<parallel>, #tpu.dimension_semantics<parallel>], iteration_bounds = array<i64: 2, 1>, scalar_prefetch = 0 : i64, scratch_operands = 0 : i64, tpu.core_type = #tpu.core_type<tc>, window_params = [{transform_indices = @transform_0, window_bounds = array<i64: 1, 16, 32>}, {pipeline_mode = #tpu.pipeline_mode<synchronous>, transform_indices = @transform_1, window_bounds = array<i64: 1, 8, 32>}, {transform_indices = @transform_2, window_bounds = array<i64: 1, 16, 32>}]} {
    %c0 = arith.constant 0 : index
    %c0_0 = arith.constant 0 : index
    %c0_1 = arith.constant 0 : index
    %0 = vector.load %arg2[%c0, %c0_0, %c0_1] : memref<1x16x32xf32, #tpu.memory_space<vmem>>, vector<1x16x32xf32>
    %1 = vector.shape_cast %0 : vector<1x16x32xf32> to vector<16x32xf32>
    %c0_2 = arith.constant 0 : index
    %c0_3 = arith.constant 0 : index
    %c0_4 = arith.constant 0 : index
    %2 = vector.load %arg3[%c0_2, %c0_3, %c0_4] : memref<1x8x32xf32, #tpu.memory_space<vmem>>, vector<1x8x32xf32>
    %3 = vector.shape_cast %2 : vector<1x8x32xf32> to vector<8x32xf32>
    %cst = arith.constant 0.000000e+00 : f32
    %4 = vector.broadcast %cst : f32 to vector<16x32xf32>
    %cst_5 = arith.constant dense<0.000000e+00> : vector<16x8xf32>
    %5 = tpu.matmul %1, %3, %cst_5 {dimension_numbers = #tpu.dot_dimension_numbers<[1], [1], [0], [0], [0, 0, 1, 0], [], []>} : vector<16x32xf32>, vector<8x32xf32>, vector<16x8xf32> -> vector<16x8xf32>
    %cst_6 = arith.constant dense<0.000000e+00> : vector<16x32xf32>
    %6 = tpu.matmul %5, %3, %cst_6 {dimension_numbers = #tpu.dot_dimension_numbers<[1], [0], [0], [1], [0, 0, 1, 1], [], []>} : vector<16x8xf32>, vector<8x32xf32>, vector<16x32xf32> -> vector<16x32xf32>
    %7 = arith.addf %4, %6 : vector<16x32xf32>
    %8 = arith.addf %7, %1 : vector<16x32xf32>
    %c0_7 = arith.constant 0 : index
    %c0_8 = arith.constant 0 : index
    %c0_9 = arith.constant 0 : index
    %9 = vector.load %arg4[%c0_7, %c0_8, %c0_9] : memref<1x16x32xf32, #tpu.memory_space<vmem>>, vector<1x16x32xf32>
    %10 = vector.shape_cast %9 : vector<1x16x32xf32> to vector<16x32xf32>
    %11 = vector.shape_cast %8 : vector<16x32xf32> to vector<1x16x32xf32>
    tpu.vector_store %arg4[%c0_7, %c0_8, %c0_9], %11 {strides = array<i32>} : memref<1x16x32xf32, #tpu.memory_space<vmem>>, vector<1x16x32xf32>,
    return
  }
  func.func @transform_0(%arg0: i32, %arg1: i32) -> (i32, i32, i32) {
    %c0_i32 = arith.constant 0 : i32
    %c0_i32_0 = arith.constant 0 : i32
    return %arg0, %arg1, %c0_i32 : i32, i32, i32
  }
  func.func @transform_1(%arg0: i32, %arg1: i32) -> (i32, i32, i32) {
    %c0_i32 = arith.constant 0 : i32
    %c0_i32_0 = arith.constant 0 : i32
    %c0_i32_1 = arith.constant 0 : i32
    return %arg0, %c0_i32, %c0_i32_0 : i32, i32, i32
  }
  func.func @transform_2(%arg0: i32, %arg1: i32) -> (i32, i32, i32) {
    %c0_i32 = arith.constant 0 : i32
    %c0_i32_0 = arith.constant 0 : i32
    return %arg0, %arg1, %c0_i32 : i32, i32, i32
  }
}

</mosaic_0001>

<bundles_post_ra>
// kernel: tpu_custom_call.1
= control target key start
LH: loop header
LB: loop body
LE: loop exit
PB: predicated region body
PF: predicated region fallthrough
CT: control target
= control target key end

     0   :  { %7 = vsyncpa [#allocation3], 0  ;;  %s965_s0 = inlined_call_operand.hbm [shape: f32[2,16,32], index: 0, kind: input, shape index: {}]   ;;  %s966_s1 = inlined_call_operand.hbm [shape: f32[2,8,32], index: 1, kind: input, shape index: {}]   ;;  %s967_s2 = inlined_call_operand.hbm [shape: f32[2,16,32], index: 2, kind: output, shape index: {}]  }
   0x1   :  { %9 = vsyncpa [#allocation3 + $0x1], 0 }
   0x2   :  { %10 = vsyncpa [#allocation6], 0 }
   0x3   :  { %11 = vsyncpa [#allocation4], 0 }
   0x4   :  { %13 = vsyncpa [#allocation4 + $0x1], 0  ;;  %s765_s9 = smov 0   ;;  %s767_s10 = smov 0  }
   0x5   :  { %s769_s11 = smov 0   ;;  %s771_s12 = smov 0  }
   0x6   :  { %s773_s13 = smov 0   ;;  %s775_s14 = smov 0  }
   0x7 LB: > { %s489_s15 = sadd.s32 4294967295, %s741_s14   ;;  %s490_s16 = sadd.s32 4294967294, %s741_s14   ;;  %s741_s14 = sphi %s775_s14, %s19_s14   ;;  %s737_s13 = sphi %s773_s13, %s991_s13   ;;  %s733_s12 = sphi %s771_s12, %s990_s12   ;;  %s729_s11 = sphi %s769_s11, %s989_s11   ;;  %s725_s10 = sphi %s767_s10, %s988_s10   ;;  %s721_s9 = sphi %s765_s9, %s987_s9  }
   0x8   : > { %s40_s17 = sadd.s32 1, %s729_s11  ;;  %p47_p0 = scmp.ne.s32.totalorder %s729_s11, %s725_s10 }
   0x9   : > { %p48_p1 = scmp.eq.s32.totalorder %s741_s14, 0  ;;  %p53_p2 = scmp.ne.s32.totalorder %s725_s10, %s721_s9 }
   0xa   : > { %p54_p3 = scmp.eq.s32.totalorder %s489_s15, 0  ;;  %p105_p4 = scmp.eq.s32.totalorder %s489_s15, 1 }
   0xb   : > { %p803_p5 = por %p48_p1, %p47_p0  ;;  %p111_p6 = scmp.eq.s32.totalorder %s490_s16, 1 }
   0xc   : > { %p807_p7 = por %p54_p3, %p53_p2  ;;  %p811_p8 = por %p105_p4, %p47_p0 }
   0xd   : > { %p815_p9 = por %p111_p6, %p53_p2  ;;  %p491_p10 = scmp.ge.s32.totalorder %s741_s14, 1 }
   0xe   : > { %s974_s19 = scalar_select %p807_p7, 1, 0 }
   0xf   : > { %s975_s20 = scalar_select %p811_p8, 1, 0 }
  0x10   : > { %s976_s21 = scalar_select %p815_p9, 1, 0 }
  0x11   : > { %p118_p11 = scmp.lt.s32.totalorder %s741_s14, 3  ;;  %s492_s22 = sshll.u32 %s733_s12, 7 }
  0x12   : > { %s825_s25 = scalar_lea.hbm %s966_s1, %s492_s22  ;;  %s743_s27 = smov [#allocation5]  }
  0x13   : > { %p827_p12 = pnand %p491_p10, %p118_p11  ;;  %s133_s28 = sshll.u32 %s743_s27, 4  ;;  %s134_s28 = int_to_ptr.vmem [resolvable:$true] %s133_s28 }
  0x14   : > { %p546_p1 = scmp.lt.s32.totalorder %s741_s14, 2  ;;  %s144_s29 = sand.u32 1, %s729_s11  }
  0x15   : > { %s977_s26 = scalar_select %p827_p12, 1, 0 }
  0x16   : > { %p534_p0 = pneg %p827_p12  ;;  %p844_p3 = pnand %p546_p1, %p803_p5 }
  0x17   : > { %s601_s4 = scalar_lea.hbm %s825_s25, 128  ;;  %s606_s7 = scalar_lea.hbm %s966_s1, 256 }
  0x18   : > { %p838_p2 = pnand %p534_p0, %p807_p7  ;;  %p602_p4 = scmp.ne.s32.totalorder %s825_s25, %s601_s4 }
  0x19   : > { %s979_s3 = scalar_select %p844_p3, 1, 0 }
  0x1a   : > { %p603_p6 = pneg %p838_p2  ;;  %p607_p0 = scmp.lt.s32.totalorder %s825_s25, %s966_s1 }
  0x1b   : > { %p608_p13 = scmp.lt.s32.totalorder %s606_s7, %s601_s4 }
  0x1c   : > { %p604_p10 = pnand %p603_p6, %p602_p4 }
  0x1d   : > { %p609_p9 = por %p608_p13, %p607_p0 }
  0x1e   : > { %p605_p11 = pneg %p604_p10 }
  0x20   : > { %p610_p5 = pnand %p609_p9, %p605_p11 }
  0x22   : > { %613 = shalt.err (!%p610_p5)
}
  0x23   : > { %s614_s16 = scalar_lea.vmem %s134_s28, 128  ;;  %p622_p12 = scmp.lt.s32.totalorder %s134_s28, %s134_s28 }
  0x24   : > { %p615_p1 = scmp.ne.s32.totalorder %s134_s28, %s614_s16  ;;  %p623_p3 = scmp.lt.s32.totalorder %s614_s16, %s614_s16 }
  0x26   : > { %p617_p8 = pnand %p615_p1, %p603_p6  ;;  %p624_p4 = por %p623_p3, %p622_p12 }
  0x28   : > { %p618_p7 = pneg %p617_p8 }
  0x2a   : > { %p625_p10 = pnand %p624_p4, %p618_p7 }
  0x2c   : > { %628 = shalt.err (!%p625_p10)
}
  0x2d   : > { %537 = dma.hbm_to_vmem [thread:$0]  (!%p838_p2), %s825_s25, 128, %s134_s28, [#allocation6]  }
  0x2e   : > { %s31_s18 = sadd.s32 1, %s737_s13  ;;  %s494_s22 = sshll.u32 %s144_s29, 4 }
  0x2f   : > { %p33_p9 = scmp.ge.s32.totalorder %s31_s18, 2  ;;  %s510_s23 = sshll.u32 %s737_s13, 8 }
  0x30   : > { %s148_s24 = scalar_lea.vmem [#allocation2], %s494_s22  ;;  %s156_s30 = scalar_lea.hbm %s965_s0, %s510_s23 }
  0x31   : > { %s157_s27 = sshll.u32 %s148_s24, 4  ;;  %s993_s18 = smov (%p33_p9, %s31_s18), 0  ;;  %s158_s27 = int_to_ptr.vmem [resolvable:$true] %s157_s27 }
  0x32   : > { %s35_s6 = ssub.s32 %s737_s13, %s993_s18  ;;  %s145_s25 = scalar_lea.sflag [#allocation3], %s144_s29 }
  0x33   : > { %p873_p7 = scmp.eq.s32.totalorder %s35_s6, 0  ;;  %p981_p8 = scmp.ne.s32.totalorder %s979_s3, 0 }
  0x34   : > { %s642_s28 = scalar_lea.vmem %s158_s27, 256  ;;  %s744_s8 = smov [#allocation2]  }
  0x35   : > { %p631_p12 = pneg %p981_p8  ;;  %p643_p13 = scmp.ne.s32.totalorder %s158_s27, %s642_s28 }
  0x36   : > { %s647_s15 = sshll.u32 %s744_s8, 4  ;;  %s648_s15 = int_to_ptr.vmem [resolvable:$false] %s647_s15 }
  0x37   : > { %p645_p2 = pnand %p643_p13, %p631_p12  ;;  %s649_s16 = scalar_lea.vmem %s648_s15, 512 }
  0x38   : > { %p650_p6 = scmp.lt.s32.totalorder %s158_s27, %s648_s15  ;;  %p651_p11 = scmp.lt.s32.totalorder %s649_s16, %s642_s28 }
  0x39   : > { %p646_p3 = pneg %p645_p2 }
  0x3a   : > { %p652_p0 = por %p651_p11, %p650_p6 }
  0x3c   : > { %p653_p5 = pnand %p652_p0, %p646_p3 }
  0x3e   : > { %656 = shalt.err (!%p653_p5)
}
  0x3f   : > { %s745_s22 = smov 128   ;;  %s746_s29 = smov 8  }
  0x40   : > { %541 = dma.hbm_to_vmem [thread:$0]  (!%p981_p8), %s156_s30, 256, %s158_s27, %s145_s25, %s745_s22, %s745_s22, %s746_s29  }
  0x41   : > { %s888_s23 = scalar_select %p873_p7, %s729_s11, %s40_s17  }
  0x42   : > { %p982_p1 = scmp.ne.s32.totalorder %s977_s26, 0 }
  0x43   : > { %s893_s24 = sand.u32 (!%p982_p1), 1, %s725_s10   ;;  %p983_p4 = scmp.ne.s32.totalorder (!%p982_p1), %s974_s19, 0 }
  0x44   : > { %169 = sbr.rel (%p982_p1) target bundleno = 488 (0x1e8), region = 28  ;;  %s498_s4 = sshll.u32 (!%p982_p1), %s893_s24, 4 }
  0x45   : > { %s172_s5 = scalar_lea.sflag (!%p982_p1), [#allocation3], %s893_s24  ;;  %s175_s6 = scalar_lea.vmem (!%p982_p1), [#allocation2], %s498_s4 }
  0x49   : > { %708 = dma.done.wait (%p983_p4), %s172_s5, 256  }
  0x4a   : > { %710 = vsyncadd (%p983_p4), %s172_s5, 4294967040 }
  0x4b   : > { %712 = dma.done.wait (%p983_p4), [#allocation6], 128  }
  0x4c   : > { %714 = vsyncadd (%p983_p4), [#allocation6], 4294967168  ;;  %vm205_vm0 = vcmask 261120   ;;  %v204_v0 = vld [vmem:[#allocation5] sm:$0xff]  ;;  %v203_v1 = vld [vmem:[%s175_s6 + $0x8] sm:$0xff]  ;;  %vm290_vm1 = vcmask 64512  }
  0x4d   : > { %518 = vmatprep.subr.msk.mxu0 %vm205_vm0, %v204_v0  ;;  %523 = vmatprep.subr.mxu1 %v204_v0  ;;  %v202_v4 = vld [vmem:[%s175_s6] sm:$0xff]  ;;  %s199_s17 = scalar_lea.vmem [#allocation7], %s498_s4  ;;  %s511_s26 = sshll.u32 %s733_s12, 8 }
  0x4e   : > { %519 = vmatpush3.xpose.msk.msra.mxu0 %vm205_vm0, %v204_v0  ;;  %524 = vmatpush3.msra.mxu1 %v204_v0  ;;  %s390_s19 = sshll.u32 %s199_s17, 4  ;;  %s915_s30 = scalar_lea.hbm %s967_s2, %s511_s26  ;;  %s910_s19 = int_to_ptr.vmem [resolvable:$true] %s390_s19 }
  0x4f   : > { %s375_s7 = scalar_lea.sflag [#allocation4], %s893_s24  ;;  %s657_s12 = scalar_lea.vmem %s910_s19, 256 }
  0x50   : > { %p658_p10 = scmp.ne.s32.totalorder %s910_s19, %s657_s12  ;;  %p984_p9 = scmp.ne.s32.totalorder %s975_s20, 0 }
  0x51   : > { %521 = vmatmul.mubr.msk.f32.vlgmr.msra.gmra.mxu0 %vm205_vm0, %v203_v1  ;;  %s747_s25 = smov [#allocation7]  }
  0x52   : > { %520 = vmatprep.mubr.msk.f32.mxu0 %vm205_vm0, %v202_v4  ;;  %p659_p7 = pnand %p658_p10, %p984_p9  ;;  %s661_s28 = sshll.u32 %s747_s25, 4  ;;  %s662_s28 = int_to_ptr.vmem [resolvable:$false] %s661_s28 }
  0x53   : > { %s663_s8 = scalar_lea.vmem %s662_s28, 512  ;;  %p664_p12 = scmp.lt.s32.totalorder %s910_s19, %s662_s28 }
  0x54   : > { %p660_p8 = pneg %p659_p7  ;;  %p665_p13 = scmp.lt.s32.totalorder %s663_s8, %s657_s12 }
  0x56   : > { %p666_p2 = por %p665_p13, %p664_p12 }
  0x58   : > { %p667_p3 = pnand %p666_p2, %p660_p8 }
 0x111   : > { %v522_v2 = vpop.f32.mrf.mxu0 }
 0x113   : > { %v281_v3 = vpop.f32.mrf.mxu0 }
 0x114   : > { %525 = vmatprep.mubr.msk.f32.mxu1 %vm290_vm1, %v281_v3 }
 0x115   : > { %526 = vmatmul.mubr.msk.f32.vlgmr.msra.gmra.mxu1 %vm290_vm1, %v522_v2 }
 0x1d5   : > { %v527_v5 = vpop.f32.mrf.mxu1 }
 0x1d6   : > { %v369_v6 = vadd.f32 %v527_v5, %v203_v1 }
 0x1d7   : > { %v363_v7 = vpop.f32.mrf.mxu1 }
 0x1d8   : > { %373 = vst.msk [vmem:[%s199_s17 + $0x8] sm:$0xff] %vm205_vm0, %v369_v6  ;;  %v364_v8 = vadd.f32 %v363_v7, %v202_v4 }
 0x1da   : > { %372 = vst.msk [vmem:[%s199_s17] sm:$0xff] %vm205_vm0, %v364_v8 }
 0x1db   : > { %670 = shalt.err (!%p667_p3)
}
 0x1dc   : > { %s671_s15 = scalar_lea.hbm %s915_s30, 256  ;;  %s675_s29 = scalar_lea.hbm %s967_s2, 512 }
 0x1dd   : > { %p672_p6 = scmp.ne.s32.totalorder %s915_s30, %s671_s15  ;;  %p676_p5 = scmp.lt.s32.totalorder %s915_s30, %s967_s2 }
 0x1de   : > { %p677_p1 = scmp.lt.s32.totalorder %s675_s29, %s671_s15 }
 0x1df   : > { %p673_p11 = pnand %p672_p6, %p984_p9 }
 0x1e0   : > { %p678_p4 = por %p677_p1, %p676_p5 }
 0x1e1   : > { %p674_p0 = pneg %p673_p11 }
 0x1e3   : > { %p679_p10 = pnand %p678_p4, %p674_p0 }
 0x1e5   : > { %682 = shalt.err (!%p679_p10)
}
 0x1e6   : > { %s748_s6 = smov 128   ;;  %s749_s17 = smov 8  }
 0x1e7   : > { %532 = dma.vmem_to_hbm [thread:$0]  (%p984_p9), %s910_s19, 256, %s915_s30, %s375_s7, %s748_s6, %s748_s6, %s749_s17  }
 0x1e8 PF: > { %s405_s26 = sand.u32 1, %s721_s9   ;;  %p985_p7 = scmp.ne.s32.totalorder %s976_s21, 0 }
 0x1e9   : > { %p986_p8 = scmp.ge.s32.totalorder %s741_s14, 2  ;;  %s406_s3 = scalar_lea.sflag [#allocation4], %s405_s26 }
 0x1eb   : > { %p543_p12 = pnand %p986_p8, %p985_p7 }
 0x1ed   : > { %p544_p13 = pneg %p543_p12 }
 0x1ef   : > { %716 = dma.done.wait (%p544_p13), %s406_s3, 256  }
 0x1f0   : > { %718 = vsyncadd (%p544_p13), %s406_s3, 4294967040  ;;  %s19_s14 = sadd.s32 1, %s741_s14   ;;  %s987_s9 = smov %s725_s10 }
 0x1f1   : > { %p16_p2 = scmp.ge.s32.totalorder %s19_s14, 4   ;;  %s988_s10 = smov %s729_s11 }
 0x1f2   : > { %s989_s11 = smov %s888_s23  ;;  %s990_s12 = smov %s737_s13 }
 0x1f3   : > { %s991_s13 = smov %s993_s18  ;;  %18 = sbr.rel (!%p16_p2) target bundleno = 7 (0x7), region = 78 }
 0x1f8   :  { %411 = vsyncpa [#allocation3], 1 }
 0x1f9   :  { %413 = vsyncpa [#allocation3 + $0x1], 1 }
 0x1fa   :  { %414 = vsyncpa [#allocation6], 1 }
 0x1fb   :  { %415 = vsyncpa [#allocation4], 1 }
 0x1fc   :  { %417 = vsyncpa [#allocation4 + $0x1], 1 }

</bundles_post_ra>
